<compile_context>
chip_gen: v5e
topology: v5e:2x2
jax: 0.10.0
libtpu: 0.0.40
codegen_flags: <defaults>
</compile_context>

<pallas_src>
import jax
import jax.numpy as jnp
from jax.experimental import pallas as pl
from jax.experimental.pallas import tpu as pltpu


def _round_up(x, m):
    return ((x + m - 1) // m) * m


def _perturb_kernel(sa_ref, w1_ref, b1_ref, w2_ref, b2_ref, w3_ref, b3_ref,
                    out_ref):
    # Layer 1: Linear + ReLU.  Weights arrive already in bf16; activations are
    # cast on the fly (free VPU work hidden under the MXU), accumulation f32.
    sa_bf = sa_ref[...].astype(jnp.bfloat16)
    h1 = jnp.dot(sa_bf, w1_ref[...],
                 preferred_element_type=jnp.float32) + b1_ref[...]
    h1 = jnp.maximum(h1, 0.0)

    # Layer 2: Linear + ReLU (dominant matmul, Hp x Hp).
    h2 = jnp.dot(h1.astype(jnp.bfloat16), w2_ref[...],
                 preferred_element_type=jnp.float32) + b2_ref[...]
    h2 = jnp.maximum(h2, 0.0)

    # Layer 3: Linear + Tanh, scaled by 0.1 (zero-padded columns stay 0).
    h3 = jnp.dot(h2.astype(jnp.bfloat16), w3_ref[...],
                 preferred_element_type=jnp.float32) + b3_ref[...]
    out_ref[...] = (0.1 * jnp.tanh(h3)).astype(out_ref.dtype)


def init_params(key, state_dim, action_dim, hidden_dim=256):
    """PyTorch nn.Linear-style init: U(-1/sqrt(fan_in), 1/sqrt(fan_in)).

    Weights stored as (in_features, out_features) so layers are x @ W + b.
    """
    def linear(k, fan_in, fan_out):
        kw, kb = jax.random.split(k)
        bound = 1.0 / jnp.sqrt(jnp.float32(fan_in))
        w = jax.random.uniform(kw, (fan_in, fan_out), jnp.float32, -bound, bound)
        b = jax.random.uniform(kb, (1, fan_out), jnp.float32, -bound, bound)
        return w, b

    k1, k2, k3 = jax.random.split(key, 3)
    w1, b1 = linear(k1, state_dim + action_dim, hidden_dim)
    w2, b2 = linear(k2, hidden_dim, hidden_dim)
    w3, b3 = linear(k3, hidden_dim, action_dim)
    return {"w1": w1, "b1": b1, "w2": w2, "b2": b2, "w3": w3, "b3": b3}


def prepare_params(params, action_dim):
    """Zero-pad hidden/output dims to 128 lanes and pre-cast weights to bf16.

    Biases stay f32 (added post-accumulation in the kernel).
    """
    hidden_dim = params["w2"].shape[0]
    hp = _round_up(max(hidden_dim, 128), 128)
    ap = _round_up(max(action_dim, 128), 128)

    def pad2(x, rows, cols, dtype):
        x = jnp.pad(x, ((0, rows - x.shape[0]), (0, cols - x.shape[1])))
        return x.astype(dtype)

    sa_dim = params["w1"].shape[0]
    return {
        "w1": pad2(params["w1"], sa_dim, hp, jnp.bfloat16),
        "b1": pad2(params["b1"], 1, hp, jnp.float32),
        "w2": pad2(params["w2"], hp, hp, jnp.bfloat16),
        "b2": pad2(params["b2"], 1, hp, jnp.float32),
        "w3": pad2(params["w3"], hp, ap, jnp.bfloat16),
        "b3": pad2(params["b3"], 1, ap, jnp.float32),
        "action_dim": action_dim,
    }


def _choose_batch_tiling(B, max_tb=1024, min_steps=2):
    """Pick (TB, grid_n, B_pad).

    - TB is a multiple of 8 sublanes, capped at `max_tb` rows (sweepable).
    - At least `min_steps` grid steps when B permits (v7x: 2 TensorCores and
      grid=1 also defeats input/output DMA pipelining).
    - Batch padding stays small (< TB, typically < 8 rows).
    """
    max_steps = max(1, pl.cdiv(B, 8))
    n_steps = min(max(min_steps, pl.cdiv(B, max_tb)), max_steps)
    tb = _round_up(pl.cdiv(B, n_steps), 8)
    grid_n = pl.cdiv(B, tb)
    return tb, grid_n, grid_n * tb


def perturbation_network_forward(state, action, prepped):
    """Pallas forward of PerturbationNetwork.

    state:   (B, state_dim) float32
    action:  (B, action_dim) or (B,) float32
    prepped: output of prepare_params (padded weights; w* in bf16, b* in f32)
    returns: (B, action_dim) float32
    """
    if action.ndim == 1:
        action = action[:, None]
    state = state.astype(jnp.float32)
    action = action.astype(jnp.float32)

    B = state.shape[0]
    SA = state.shape[1] + action.shape[1]
    Hp = prepped["w2"].shape[0]
    Ap = prepped["w3"].shape[1]
    action_dim = prepped["action_dim"]

    TB, grid_n, B_pad = _choose_batch_tiling(B)

    # Fold concat into the MXU by building the (B, S+A) LHS once; the tiny
    # batch pad (< TB rows) fuses into the same XLA pass.
    sa = jnp.concatenate([state, action], axis=1)
    if B_pad != B:
        sa = jnp.pad(sa, ((0, B_pad - B), (0, 0)))

    flops = 2 * B_pad * (SA * Hp + Hp * Hp + Hp * Ap)
    bytes_accessed = (4 * B_pad * (SA + Ap)                    # f32 activations
                      + 2 * (SA * Hp + Hp * Hp + Hp * Ap)      # bf16 weights
                      + 4 * (2 * Hp + Ap))                     # f32 biases
    cost = pl.CostEstimate(flops=flops,
                           transcendentals=B_pad * Ap,
                           bytes_accessed=bytes_accessed)

    # Resident (never-changing) parameter blocks: constant index_map + a single
    # buffer (no point double-buffering something that is never re-fetched).
    def resident(shape):
        return pl.BlockSpec(shape, lambda i: (0, 0),
                            pipeline_mode=pl.Buffered(1))

    out = pl.pallas_call(
        _perturb_kernel,
        out_shape=jax.ShapeDtypeStruct((B_pad, Ap), jnp.float32),
        grid=(grid_n,),
        in_specs=[
            pl.BlockSpec((TB, SA), lambda i: (i, 0)),   # activation tile
            resident((SA, Hp)),                         # w1 (bf16)
            resident((1, Hp)),                          # b1
            resident((Hp, Hp)),                         # w2 (bf16)
            resident((1, Hp)),                          # b2
            resident((Hp, Ap)),                         # w3 (bf16)
            resident((1, Ap)),                          # b3
        ],
        out_specs=pl.BlockSpec((TB, Ap), lambda i: (i, 0)),
        compiler_params=pltpu.CompilerParams(
            dimension_semantics=("parallel",)),
        cost_estimate=cost,
    )(sa,
      prepped["w1"], prepped["b1"],
      prepped["w2"], prepped["b2"],
      prepped["w3"], prepped["b3"])

    return out[:B, :action_dim]


def reference_forward(state, action, params):
    if action.ndim == 1:
        action = action[:, None]
    sa = jnp.concatenate([state, action], axis=1)
    h = jnp.maximum(sa @ params["w1"] + params["b1"], 0.0)
    h = jnp.maximum(h @ params["w2"] + params["b2"], 0.0)
    return 0.1 * jnp.tanh(h @ params["w3"] + params["b3"])


if __name__ == "__main__":
    key = jax.random.PRNGKey(0)
    k_params, k_state, k_action = jax.random.split(key, 3)

    batch = 2
    state_dim = 12
    action_dim = 4
    hidden_dim = 32

    params = init_params(k_params, state_dim, action_dim, hidden_dim)
    prepped = prepare_params(params, action_dim)

    state = jax.random.normal(k_state, (batch, state_dim), jnp.float32)
    action = jax.random.normal(k_action, (batch, action_dim), jnp.float32)

    out = perturbation_network_forward(state, action, prepped)
    out = jax.block_until_ready(out)

    ref = reference_forward(state, action, params)
    assert out.shape == (batch, action_dim)
    # bf16 MXU operands with f32 accumulation on a 0.1*tanh-bounded output:
    # loose-ish tolerance.
    assert jnp.allclose(out, ref, atol=5e-3, rtol=5e-2), (
        f"max abs err {jnp.max(jnp.abs(out - ref))}")

    print("KERNEL_OK")
</pallas_src>

<mosaic_0001>
module attributes {stable_mosaic.version = 11 : i64} {
  func.func @_perturb_kernel(%arg0: i32, %arg1: memref<8x16xf32, #tpu.memory_space<vmem>>, %arg2: memref<16x128xbf16, #tpu.memory_space<vmem>>, %arg3: memref<1x128xf32, #tpu.memory_space<vmem>>, %arg4: memref<128x128xbf16, #tpu.memory_space<vmem>>, %arg5: memref<1x128xf32, #tpu.memory_space<vmem>>, %arg6: memref<128x128xbf16, #tpu.memory_space<vmem>>, %arg7: memref<1x128xf32, #tpu.memory_space<vmem>>, %arg8: memref<8x128xf32, #tpu.memory_space<vmem>>) attributes {dimension_semantics = [#tpu.dimension_semantics<parallel>], iteration_bounds = array<i64: 1>, scalar_prefetch = 0 : i64, scratch_operands = 0 : i64, tpu.core_type = #tpu.core_type<tc>, window_params = [{transform_indices = @transform_0, window_bounds = array<i64: 8, 16>}, {pipeline_mode = #tpu.pipeline_mode<synchronous>, transform_indices = @transform_1, window_bounds = array<i64: 16, 128>}, {pipeline_mode = #tpu.pipeline_mode<synchronous>, transform_indices = @transform_2, window_bounds = array<i64: 1, 128>}, {pipeline_mode = #tpu.pipeline_mode<synchronous>, transform_indices = @transform_3, window_bounds = array<i64: 128, 128>}, {pipeline_mode = #tpu.pipeline_mode<synchronous>, transform_indices = @transform_4, window_bounds = array<i64: 1, 128>}, {pipeline_mode = #tpu.pipeline_mode<synchronous>, transform_indices = @transform_5, window_bounds = array<i64: 128, 128>}, {pipeline_mode = #tpu.pipeline_mode<synchronous>, transform_indices = @transform_6, window_bounds = array<i64: 1, 128>}, {transform_indices = @transform_7, window_bounds = array<i64: 8, 128>}]} {
    %c0 = arith.constant 0 : index
    %c0_0 = arith.constant 0 : index
    %0 = vector.load %arg1[%c0, %c0_0] : memref<8x16xf32, #tpu.memory_space<vmem>>, vector<8x16xf32>
    %1 = arith.truncf %0 : vector<8x16xf32> to vector<8x16xbf16>
    %c0_1 = arith.constant 0 : index
    %c0_2 = arith.constant 0 : index
    %2 = vector.load %arg2[%c0_1, %c0_2] : memref<16x128xbf16, #tpu.memory_space<vmem>>, vector<16x128xbf16>
    %cst = arith.constant dense<0.000000e+00> : vector<8x128xf32>
    %3 = tpu.matmul %1, %2, %cst {dimension_numbers = #tpu.dot_dimension_numbers<[1], [0], [0], [1], [0, 0, 1, 1], [], []>} : vector<8x16xbf16>, vector<16x128xbf16>, vector<8x128xf32> -> vector<8x128xf32>
    %c0_3 = arith.constant 0 : index
    %c0_4 = arith.constant 0 : index
    %4 = vector.load %arg3[%c0_3, %c0_4] : memref<1x128xf32, #tpu.memory_space<vmem>>, vector<1x128xf32>
    %5 = vector.broadcast %4 : vector<1x128xf32> to vector<8x128xf32>
    %6 = arith.addf %3, %5 : vector<8x128xf32>
    %cst_5 = arith.constant 0.000000e+00 : f32
    %7 = vector.broadcast %cst_5 : f32 to vector<8x128xf32>
    %8 = arith.maximumf %6, %7 : vector<8x128xf32>
    %9 = arith.truncf %8 : vector<8x128xf32> to vector<8x128xbf16>
    %c0_6 = arith.constant 0 : index
    %c0_7 = arith.constant 0 : index
    %10 = vector.load %arg4[%c0_6, %c0_7] : memref<128x128xbf16, #tpu.memory_space<vmem>>, vector<128x128xbf16>
    %cst_8 = arith.constant dense<0.000000e+00> : vector<8x128xf32>
    %11 = tpu.matmul %9, %10, %cst_8 {dimension_numbers = #tpu.dot_dimension_numbers<[1], [0], [0], [1], [0, 0, 1, 1], [], []>} : vector<8x128xbf16>, vector<128x128xbf16>, vector<8x128xf32> -> vector<8x128xf32>
    %c0_9 = arith.constant 0 : index
    %c0_10 = arith.constant 0 : index
    %12 = vector.load %arg5[%c0_9, %c0_10] : memref<1x128xf32, #tpu.memory_space<vmem>>, vector<1x128xf32>
    %13 = vector.broadcast %12 : vector<1x128xf32> to vector<8x128xf32>
    %14 = arith.addf %11, %13 : vector<8x128xf32>
    %cst_11 = arith.constant 0.000000e+00 : f32
    %15 = vector.broadcast %cst_11 : f32 to vector<8x128xf32>
    %16 = arith.maximumf %14, %15 : vector<8x128xf32>
    %17 = arith.truncf %16 : vector<8x128xf32> to vector<8x128xbf16>
    %c0_12 = arith.constant 0 : index
    %c0_13 = arith.constant 0 : index
    %18 = vector.load %arg6[%c0_12, %c0_13] : memref<128x128xbf16, #tpu.memory_space<vmem>>, vector<128x128xbf16>
    %cst_14 = arith.constant dense<0.000000e+00> : vector<8x128xf32>
    %19 = tpu.matmul %17, %18, %cst_14 {dimension_numbers = #tpu.dot_dimension_numbers<[1], [0], [0], [1], [0, 0, 1, 1], [], []>} : vector<8x128xbf16>, vector<128x128xbf16>, vector<8x128xf32> -> vector<8x128xf32>
    %c0_15 = arith.constant 0 : index
    %c0_16 = arith.constant 0 : index
    %20 = vector.load %arg7[%c0_15, %c0_16] : memref<1x128xf32, #tpu.memory_space<vmem>>, vector<1x128xf32>
    %21 = vector.broadcast %20 : vector<1x128xf32> to vector<8x128xf32>
    %22 = arith.addf %19, %21 : vector<8x128xf32>
    %23 = math.tanh %22 : vector<8x128xf32>
    %cst_17 = arith.constant 1.000000e-01 : f32
    %24 = vector.broadcast %cst_17 : f32 to vector<8x128xf32>
    %25 = arith.mulf %24, %23 : vector<8x128xf32>
    %c0_18 = arith.constant 0 : index
    %c0_19 = arith.constant 0 : index
    %26 = vector.load %arg8[%c0_18, %c0_19] : memref<8x128xf32, #tpu.memory_space<vmem>>, vector<8x128xf32>
    tpu.vector_store %arg8[%c0_18, %c0_19], %25 {strides = array<i32>} : memref<8x128xf32, #tpu.memory_space<vmem>>, vector<8x128xf32>,
    return
  }
  func.func @transform_0(%arg0: i32) -> (i32, i32) {
    %c0_i32 = arith.constant 0 : i32
    %c0_i32_0 = arith.constant 0 : i32
    return %arg0, %c0_i32 : i32, i32
  }
  func.func @transform_1(%arg0: i32) -> (i32, i32) {
    %c0_i32 = arith.constant 0 : i32
    %c0_i32_0 = arith.constant 0 : i32
    %c0_i32_1 = arith.constant 0 : i32
    return %c0_i32, %c0_i32_0 : i32, i32
  }
  func.func @transform_2(%arg0: i32) -> (i32, i32) {
    %c0_i32 = arith.constant 0 : i32
    %c0_i32_0 = arith.constant 0 : i32
    %c0_i32_1 = arith.constant 0 : i32
    return %c0_i32, %c0_i32_0 : i32, i32
  }
  func.func @transform_3(%arg0: i32) -> (i32, i32) {
    %c0_i32 = arith.constant 0 : i32
    %c0_i32_0 = arith.constant 0 : i32
    %c0_i32_1 = arith.constant 0 : i32
    return %c0_i32, %c0_i32_0 : i32, i32
  }
  func.func @transform_4(%arg0: i32) -> (i32, i32) {
    %c0_i32 = arith.constant 0 : i32
    %c0_i32_0 = arith.constant 0 : i32
    %c0_i32_1 = arith.constant 0 : i32
    return %c0_i32, %c0_i32_0 : i32, i32
  }
  func.func @transform_5(%arg0: i32) -> (i32, i32) {
    %c0_i32 = arith.constant 0 : i32
    %c0_i32_0 = arith.constant 0 : i32
    %c0_i32_1 = arith.constant 0 : i32
    return %c0_i32, %c0_i32_0 : i32, i32
  }
  func.func @transform_6(%arg0: i32) -> (i32, i32) {
    %c0_i32 = arith.constant 0 : i32
    %c0_i32_0 = arith.constant 0 : i32
    %c0_i32_1 = arith.constant 0 : i32
    return %c0_i32, %c0_i32_0 : i32, i32
  }
  func.func @transform_7(%arg0: i32) -> (i32, i32) {
    %c0_i32 = arith.constant 0 : i32
    %c0_i32_0 = arith.constant 0 : i32
    return %arg0, %c0_i32 : i32, i32
  }
}

</mosaic_0001>

<bundles_post_ra>
// kernel: tpu_custom_call.1
= control target key start
LH: loop header
LB: loop body
LE: loop exit
PB: predicated region body
PF: predicated region fallthrough
CT: control target
= control target key end

     0   :  { %12 = vsyncpa [#allocation3], 0  ;;  %s605_s0 = inlined_call_operand.hbm [shape: f32[8,16], index: 0, kind: input, shape index: {}]   ;;  %s606_s1 = inlined_call_operand.hbm [shape: bf16[16,128], index: 1, kind: input, shape index: {}]   ;;  %s607_s2 = inlined_call_operand.vmem [shape: f32[1,128], index: 2, kind: input, shape index: {}]   ;;  %s608_s3 = inlined_call_operand.hbm [shape: bf16[128,128], index: 3, kind: input, shape index: {}]   ;;  %s609_s4 = inlined_call_operand.vmem [shape: f32[1,128], index: 4, kind: input, shape index: {}]   ;;  %s610_s5 = inlined_call_operand.hbm [shape: bf16[128,128], index: 5, kind: input, shape index: {}]   ;;  %s611_s6 = inlined_call_operand.vmem [shape: f32[1,128], index: 6, kind: input, shape index: {}]   ;;  %s612_s7 = inlined_call_operand.hbm [shape: f32[8,128], index: 7, kind: output, shape index: {}]  }
   0x1   :  { %13 = vsyncpa [#allocation6], 0 }
   0x2   :  { %14 = vsyncpa [#allocation9], 0  ;;  %s31_s26 = sshll.u32 %s606_s1, 4  ;;  %s32_s26 = int_to_ptr.hbm [resolvable:$true] %s31_s26 }
   0x3   :  { %15 = vsyncpa [#allocation4], 0  ;;  %s534_s27 = smov [#allocation5]   ;;  %s21_s8 = sshll.u32 %s605_s0, 4  ;;  %s22_s8 = int_to_ptr.hbm [resolvable:$true] %s21_s8 }
   0x4   :  { %s33_s28 = sshll.u32 %s534_s27, 4  ;;  %s535_s9 = smov 64   ;;  %s34_s28 = int_to_ptr.vmem [resolvable:$true] %s33_s28 }
   0x5   :  { %s536_s10 = smov 4   ;;  %s537_s11 = smov [#allocation2]  }
   0x6   :  { %39 = dma.hbm_to_vmem [thread:$0]  %s32_s26, 128, %s34_s28, [#allocation6], %s535_s9, %s535_s9, %s536_s10  }
   0x7   :  { %s23_s12 = sshll.u32 %s537_s11, 4  ;;  %s46_s15 = sshll.u32 %s608_s3, 4  ;;  %s24_s12 = int_to_ptr.vmem [resolvable:$true] %s23_s12  ;;  %s47_s15 = int_to_ptr.hbm [resolvable:$true] %s46_s15 }
   0x8   :  { %26 = dma.hbm_to_vmem [thread:$0]  %s22_s8, 128, %s24_s12, [#allocation3]  }
   0x9   :  { %s61_s17 = sshll.u32 %s610_s5, 4  ;;  %s538_s18 = smov [#allocation7]   ;;  %s62_s17 = int_to_ptr.hbm [resolvable:$true] %s61_s17 }
   0xa   :  { %s48_s19 = sshll.u32 %s538_s18, 4  ;;  %s539_s0 = smov [#allocation8]   ;;  %s49_s19 = int_to_ptr.vmem [resolvable:$true] %s48_s19 }
   0xb   :  { %54 = dma.hbm_to_vmem [thread:$0]  %s47_s15, 1024, %s49_s19, [#allocation6], %s535_s9, %s535_s9, %s536_s10  }
   0xc   :  { %s63_s20 = sshll.u32 %s539_s0, 4  ;;  %s64_s20 = int_to_ptr.vmem [resolvable:$true] %s63_s20 }
   0xd   :  { %69 = dma.hbm_to_vmem [thread:$0]  %s62_s17, 1024, %s64_s20, [#allocation9], %s535_s9, %s535_s9, %s536_s10  }
   0xe   :  { %526 = dma.done.wait [#allocation3], 128  }
   0xf   :  { %527 = vsyncadd [#allocation3], 4294967168 }
  0x10   :  { %528 = dma.done.wait [#allocation6], 1152  }
  0x11   :  { %529 = vsyncadd [#allocation6], 4294966144 }
  0x12   :  { %530 = dma.done.wait [#allocation9], 1024  }
  0x13   :  { %531 = vsyncadd [#allocation9], 4294966272  ;;  %v377_v0 = vld [vmem:[#allocation5] sm:$0xff]  ;;  %v89_v1 = vld [vmem:[#allocation2] sm:$0xff]  ;;  %vm103_vm0 = vcmask 130048   ;;  %s540_s24 = smov [#allocation10]  }
  0x14   :  { %v385_v2 = vld [vmem:[#allocation7 + $0x38] sm:$0xff]  ;;  %v90_v3 = vpack.c.bf16 %v89_v1, %v89_v1  ;;  %114 = vmatpush.bf16.msra.mxu0 %v377_v0  ;;  %v384_v4 = vld [vmem:[#allocation7 + $0x30] sm:$0xff]  ;;  %v383_v5 = vld [vmem:[#allocation7 + $0x28] sm:$0xff]  ;;  %s294_s25 = sshll.u32 %s540_s24, 4  ;;  %s296_s28 = sshll.u32 %s612_s7, 4  ;;  %s295_s25 = int_to_ptr.vmem [resolvable:$true] %s294_s25  ;;  %s297_s28 = int_to_ptr.hbm [resolvable:$true] %s296_s28 }
  0x15   :  { %190 = vmatpush.bf16.msra.mxu1 %v385_v2  ;;  %v382_v6 = vld [vmem:[#allocation7 + $0x20] sm:$0xff]  ;;  %v381_v7 = vld [vmem:[#allocation7 + $0x18] sm:$0xff]  ;;  %v380_v8 = vld [vmem:[#allocation7 + $0x10] sm:$0xff] }
  0x16   :  { %v379_v9 = vld [vmem:[#allocation7 + $0x8] sm:$0xff]  ;;  %v378_v10 = vld [vmem:[#allocation7] sm:$0xff]  ;;  %v393_v11 = vld [vmem:[#allocation8 + $0x38] sm:$0xff] }
  0x17   :  { %312 = vmatmul.msk.bf16.vlgmr.msra.gmra.mxu0 %vm103_vm0, %v90_v3  ;;  %273 = vmatpush.bf16.msra.mxu2 %v393_v11  ;;  %v392_v12 = vld [vmem:[#allocation8 + $0x30] sm:$0xff]  ;;  %v391_v13 = vld [vmem:[#allocation8 + $0x28] sm:$0xff]  ;;  %v390_v14 = vld [vmem:[#allocation8 + $0x20] sm:$0xff] }
  0x18   :  { %v389_v15 = vld [vmem:[#allocation8 + $0x18] sm:$0xff]  ;;  %v388_v16 = vld [vmem:[#allocation8 + $0x10] sm:$0xff]  ;;  %v387_v23 = vld [vmem:[#allocation8 + $0x8] sm:$0xff] }
  0x19   :  { %191 = vmatpush.bf16.msra.mxu1 %v384_v4  ;;  %v401_v17 = vld [vmem:[%s607_s2] ss:$0 sm:$0xff]  ;;  %v386_v24 = vld [vmem:[#allocation8] sm:$0xff] }
  0x1a   :  { %v402_v25 = vld [vmem:[%s609_s4] ss:$0 sm:$0xff] }
  0x1b   :  { %274 = vmatpush.bf16.msra.mxu2 %v392_v12  ;;  %v403_v31 = vld [vmem:[%s611_s6] ss:$0 sm:$0xff] }
  0x1d   :  { %192 = vmatpush.bf16.msra.mxu1 %v383_v5 }
  0x1f   :  { %275 = vmatpush.bf16.msra.mxu2 %v391_v13 }
  0x21   :  { %193 = vmatpush.bf16.msra.mxu1 %v382_v6 }
  0x23   :  { %276 = vmatpush.bf16.msra.mxu2 %v390_v14 }
  0x25   :  { %194 = vmatpush.bf16.msra.mxu1 %v381_v7 }
  0x27   :  { %277 = vmatpush.bf16.msra.mxu2 %v389_v15 }
  0x29   :  { %195 = vmatpush.bf16.msra.mxu1 %v380_v8 }
  0x2b   :  { %278 = vmatpush.bf16.msra.mxu2 %v388_v16 }
  0x2d   :  { %196 = vmatpush.bf16.msra.mxu1 %v379_v9 }
  0x2f   :  { %279 = vmatpush.bf16.msra.mxu2 %v387_v23 }
  0x31   :  { %197 = vmatpush.bf16.msra.mxu1 %v378_v10 }
  0x33   :  { %280 = vmatpush.bf16.msra.mxu2 %v386_v24 }
  0x94   :  { %v116_v18 = vpop.f32.mrf.mxu0 }
  0x95   :  { %v117_v19 = vadd.f32 %v401_v17, %v116_v18 }
  0x97   :  { %v120_v20 = vmax.f32 %v117_v19, 0.0 }
  0x99   :  { %v121_v21 = vpack.c.bf16 %v120_v20, %v120_v20 }
  0x9b   :  { %198 = vmatmul.bf16.vlgmr.msra.gmra.mxu1 %v121_v21 }
  0x9c   :  { %v118_v22 = vpop.f32.mrf.mxu0 }
 0x118   :  { %v199_v26 = vpop.f32.mrf.mxu1 }
 0x119   :  { %v200_v27 = vadd.f32 %v402_v25, %v199_v26 }
 0x11b   :  { %v203_v28 = vmax.f32 %v200_v27, 0.0 }
 0x11d   :  { %v204_v29 = vpack.c.bf16 %v203_v28, %v203_v28 }
 0x11f   :  { %281 = vmatmul.bf16.vlgmr.msra.gmra.mxu2 %v204_v29 }
 0x120   :  { %v201_v30 = vpop.f32.mrf.mxu1 }
 0x1a2   :  { %v282_v32 = vpop.f32.mrf.mxu2 }
 0x1a3   :  { %v283_v33 = vadd.f32 %v403_v31, %v282_v32 }
 0x1a5   :  { %404 = vtanh.f32 %v283_v33 }
 0x1aa   :  { %v284_v34 = vpop.f32.mrf.mxu2 }
 0x1ab   :  { %v405_v35 = vpop.eup %404 }
 0x1ac   :  { %v287_v36 = vmul.f32 0.1, %v405_v35 }
 0x1ae   :  { %288 = vst [vmem:[#allocation10] sm:$0xff] %v287_v36 }
 0x1af   :  { %299 = dma.vmem_to_hbm [thread:$0]  %s295_s25, 128, %s297_s28, [#allocation4]  }
 0x1b0   :  { %532 = dma.done.wait [#allocation4], 128  }
 0x1b1   :  { %533 = vsyncadd [#allocation4], 4294967168 }
 0x1b2   :  { %304 = vsyncpa [#allocation3], 1 }
 0x1b3   :  { %305 = vsyncpa [#allocation6], 1 }
 0x1b4   :  { %306 = vsyncpa [#allocation9], 1 }
 0x1b5   :  { %307 = vsyncpa [#allocation4], 1 }

</bundles_post_ra>
